<compile_context>
chip_gen: v7x
topology: tpu7x:2x2x1
jax: 0.10.0
libtpu: 0.0.40
codegen_flags: <defaults>
</compile_context>

<pallas_src>
import functools

import jax
import jax.numpy as jnp
from jax.experimental import pallas as pl
from jax.experimental.pallas import tpu as pltpu


def _lstm_sentiment_kernel(seq_ref, emb_ref, wih_ref, whh_ref, b_ref,
                           wout_ref, bout_ref, out_ref, x_scratch):
    """seq_ref: (T,) int32 in SMEM (scalar prefetch); out_ref: (1, C)."""
    T, _ = x_scratch.shape
    H = whh_ref.shape[0]

    # --- Fused embedding gather: one dynamic row load per token (T static). ---
    for t in range(T):
        x_scratch[pl.ds(t, 1), :] = emb_ref[pl.ds(seq_ref[t], 1), :]
    x = x_scratch[...]                                    # (T, E)

    wih = wih_ref[...]                                    # (E, 4H)
    whh = whh_ref[...]                                    # (H, 4H)
    bias = b_ref[...]                                     # (1, 4H) = b_ih + b_hh

    # --- Hoisted input projection: all time steps in one MXU matmul. ---
    xw = jnp.dot(x, wih, preferred_element_type=jnp.float32) + bias  # (T, 4H)

    # --- Fully unrolled LSTM recurrence (PyTorch gate order i, f, g, o). ---
    h = jnp.zeros((1, H), jnp.float32)
    c = jnp.zeros((1, H), jnp.float32)
    for t in range(T):
        gates = xw[t:t + 1, :] + jnp.dot(
            h, whh, preferred_element_type=jnp.float32)   # (1, 4H)
        # Activate the whole 4H-wide vreg once, then slice out the gates.
        sig = jax.nn.sigmoid(gates)
        tnh = jnp.tanh(gates)
        i_g = sig[:, 0 * H:1 * H]
        f_g = sig[:, 1 * H:2 * H]
        g_g = tnh[:, 2 * H:3 * H]
        o_g = sig[:, 3 * H:4 * H]
        c = f_g * c + i_g * g_g
        h = o_g * jnp.tanh(c)

    # --- dropout -> identity (inference); classifier head. ---
    logits = (jnp.dot(h, wout_ref[...], preferred_element_type=jnp.float32)
              + bout_ref[...])                            # (1, C)
    zh = jnp.maximum(logits, 0.0)                         # relu
    m = jnp.max(zh, axis=-1, keepdims=True)
    z = zh - m
    lse = jnp.log(jnp.sum(jnp.exp(z), axis=-1, keepdims=True))
    out_ref[...] = z - lse                                # log_softmax, dim=1


@jax.jit
def lstm_sentiment_forward(seq, emb, wih_t, whh_t, bias, wout_t, bout):
    """seq: (T,) int32 token ids; params already in kernel layout.

    Returns (1, C) log-probabilities.
    """
    T = seq.shape[0]
    V, E = emb.shape
    H = whh_t.shape[0]
    C = wout_t.shape[1]

    grid_spec = pltpu.PrefetchScalarGridSpec(
        num_scalar_prefetch=1,          # seq -> SMEM, passed first to kernel
        grid=(1,),
        in_specs=[
            pl.BlockSpec((V, E), lambda i, seq: (0, 0)),        # emb table
            pl.BlockSpec((E, 4 * H), lambda i, seq: (0, 0)),    # W_ih^T
            pl.BlockSpec((H, 4 * H), lambda i, seq: (0, 0)),    # W_hh^T
            pl.BlockSpec((1, 4 * H), lambda i, seq: (0, 0)),    # b_ih + b_hh
            pl.BlockSpec((H, C), lambda i, seq: (0, 0)),        # W_out^T
            pl.BlockSpec((1, C), lambda i, seq: (0, 0)),        # b_out
        ],
        out_specs=pl.BlockSpec((1, C), lambda i, seq: (0, 0)),
        scratch_shapes=[pltpu.VMEM((T, E), jnp.float32)],       # gathered x
    )

    return pl.pallas_call(
        _lstm_sentiment_kernel,
        out_shape=jax.ShapeDtypeStruct((1, C), jnp.float32),
        grid_spec=grid_spec,
        compiler_params=pltpu.CompilerParams(
            dimension_semantics=("arbitrary",)),
    )(seq, emb, wih_t, whh_t, bias, wout_t, bout)


def prepare_params(emb, w_ih, w_hh, b_ih, b_hh, w_out, b_out):
    """One-time re-layout of PyTorch-style parameters for the kernel."""
    emb_f = emb.astype(jnp.float32)                        # (V, E)
    wih_t = w_ih.T.astype(jnp.float32)                     # (E, 4H)
    whh_t = w_hh.T.astype(jnp.float32)                     # (H, 4H)
    bias = (b_ih + b_hh).astype(jnp.float32)[None, :]      # (1, 4H)
    wout_t = w_out.T.astype(jnp.float32)                   # (H, C)
    bout = b_out.astype(jnp.float32)[None, :]              # (1, C)
    return emb_f, wih_t, whh_t, bias, wout_t, bout


def init_params(key, vocab_size, embedding_dim, hidden_dim, num_classes):
    """Deterministic init mirroring PyTorch default initializers."""
    ks = jax.random.split(key, 7)
    bound = 1.0 / jnp.sqrt(hidden_dim)
    emb = jax.random.normal(ks[0], (vocab_size, embedding_dim), jnp.float32)
    w_ih = jax.random.uniform(ks[1], (4 * hidden_dim, embedding_dim),
                              jnp.float32, -bound, bound)
    w_hh = jax.random.uniform(ks[2], (4 * hidden_dim, hidden_dim),
                              jnp.float32, -bound, bound)
    b_ih = jax.random.uniform(ks[3], (4 * hidden_dim,), jnp.float32, -bound,
                              bound)
    b_hh = jax.random.uniform(ks[4], (4 * hidden_dim,), jnp.float32, -bound,
                              bound)
    w_out = jax.random.uniform(ks[5], (num_classes, hidden_dim), jnp.float32,
                               -bound, bound)
    b_out = jax.random.uniform(ks[6], (num_classes,), jnp.float32, -bound,
                               bound)
    return emb, w_ih, w_hh, b_ih, b_hh, w_out, b_out


if __name__ == "__main__":
    vocab_size, embedding_dim, hidden_dim, num_classes = 100, 16, 32, 4
    seq_len = 8

    key = jax.random.PRNGKey(0)
    pkey, skey = jax.random.split(key)
    raw_params = init_params(pkey, vocab_size, embedding_dim, hidden_dim,
                             num_classes)
    # One-time parameter re-layout (kept out of the per-call forward path).
    params = prepare_params(*raw_params)
    params = jax.tree_util.tree_map(jax.block_until_ready, params)

    seq = jax.random.randint(skey, (seq_len,), 0, vocab_size, dtype=jnp.int32)

    scores = lstm_sentiment_forward(seq, *params)
    jax.block_until_ready(scores)

    assert scores.shape == (1, num_classes)
    # log_softmax sanity: probabilities sum to 1.
    assert jnp.allclose(jnp.sum(jnp.exp(scores)), 1.0, atol=1e-5)
    print("KERNEL_OK")
</pallas_src>

<mosaic_0001>
module attributes {stable_mosaic.version = 11 : i64} {
  func.func @_lstm_sentiment_kernel(%arg0: i32, %arg1: memref<8xi32, #tpu.memory_space<smem>>, %arg2: memref<100x16xf32, #tpu.memory_space<vmem>>, %arg3: memref<16x128xf32, #tpu.memory_space<vmem>>, %arg4: memref<32x128xf32, #tpu.memory_space<vmem>>, %arg5: memref<1x128xf32, #tpu.memory_space<vmem>>, %arg6: memref<32x4xf32, #tpu.memory_space<vmem>>, %arg7: memref<1x4xf32, #tpu.memory_space<vmem>>, %arg8: memref<1x4xf32, #tpu.memory_space<vmem>>, %arg9: memref<8x16xf32, #tpu.memory_space<vmem>>) attributes {dimension_semantics = [#tpu.dimension_semantics<arbitrary>], iteration_bounds = array<i64: 1>, scalar_prefetch = 1 : i64, scratch_operands = 1 : i64, tpu.core_type = #tpu.core_type<tc>, window_params = [{pipeline_mode = #tpu.pipeline_mode<synchronous>, transform_indices = @transform_0, window_bounds = array<i64: 100, 16>}, {pipeline_mode = #tpu.pipeline_mode<synchronous>, transform_indices = @transform_1, window_bounds = array<i64: 16, 128>}, {pipeline_mode = #tpu.pipeline_mode<synchronous>, transform_indices = @transform_2, window_bounds = array<i64: 32, 128>}, {pipeline_mode = #tpu.pipeline_mode<synchronous>, transform_indices = @transform_3, window_bounds = array<i64: 1, 128>}, {pipeline_mode = #tpu.pipeline_mode<synchronous>, transform_indices = @transform_4, window_bounds = array<i64: 32, 4>}, {pipeline_mode = #tpu.pipeline_mode<synchronous>, transform_indices = @transform_5, window_bounds = array<i64: 1, 4>}, {pipeline_mode = #tpu.pipeline_mode<synchronous>, transform_indices = @transform_6, window_bounds = array<i64: 1, 4>}]} {
    %c0 = arith.constant 0 : index
    %0 = memref.load %arg1[%c0] : memref<8xi32, #tpu.memory_space<smem>>
    %1 = arith.index_cast %0 : i32 to index
    %c0_0 = arith.constant 0 : index
    %2 = vector.load %arg2[%1, %c0_0] : memref<100x16xf32, #tpu.memory_space<vmem>>, vector<1x16xf32>
    %c0_1 = arith.constant 0 : index
    %c0_2 = arith.constant 0 : index
    %3 = vector.load %arg9[%c0_1, %c0_2] : memref<8x16xf32, #tpu.memory_space<vmem>>, vector<1x16xf32>
    tpu.vector_store %arg9[%c0_1, %c0_2], %2 {strides = array<i32>} : memref<8x16xf32, #tpu.memory_space<vmem>>, vector<1x16xf32>,
    %c1 = arith.constant 1 : index
    %4 = memref.load %arg1[%c1] : memref<8xi32, #tpu.memory_space<smem>>
    %5 = arith.index_cast %4 : i32 to index
    %c0_3 = arith.constant 0 : index
    %6 = vector.load %arg2[%5, %c0_3] : memref<100x16xf32, #tpu.memory_space<vmem>>, vector<1x16xf32>
    %c1_4 = arith.constant 1 : index
    %c0_5 = arith.constant 0 : index
    %7 = vector.load %arg9[%c1_4, %c0_5] : memref<8x16xf32, #tpu.memory_space<vmem>>, vector<1x16xf32>
    tpu.vector_store %arg9[%c1_4, %c0_5], %6 {strides = array<i32>} : memref<8x16xf32, #tpu.memory_space<vmem>>, vector<1x16xf32>,
    %c2 = arith.constant 2 : index
    %8 = memref.load %arg1[%c2] : memref<8xi32, #tpu.memory_space<smem>>
    %9 = arith.index_cast %8 : i32 to index
    %c0_6 = arith.constant 0 : index
    %10 = vector.load %arg2[%9, %c0_6] : memref<100x16xf32, #tpu.memory_space<vmem>>, vector<1x16xf32>
    %c2_7 = arith.constant 2 : index
    %c0_8 = arith.constant 0 : index
    %11 = vector.load %arg9[%c2_7, %c0_8] : memref<8x16xf32, #tpu.memory_space<vmem>>, vector<1x16xf32>
    tpu.vector_store %arg9[%c2_7, %c0_8], %10 {strides = array<i32>} : memref<8x16xf32, #tpu.memory_space<vmem>>, vector<1x16xf32>,
    %c3 = arith.constant 3 : index
    %12 = memref.load %arg1[%c3] : memref<8xi32, #tpu.memory_space<smem>>
    %13 = arith.index_cast %12 : i32 to index
    %c0_9 = arith.constant 0 : index
    %14 = vector.load %arg2[%13, %c0_9] : memref<100x16xf32, #tpu.memory_space<vmem>>, vector<1x16xf32>
    %c3_10 = arith.constant 3 : index
    %c0_11 = arith.constant 0 : index
    %15 = vector.load %arg9[%c3_10, %c0_11] : memref<8x16xf32, #tpu.memory_space<vmem>>, vector<1x16xf32>
    tpu.vector_store %arg9[%c3_10, %c0_11], %14 {strides = array<i32>} : memref<8x16xf32, #tpu.memory_space<vmem>>, vector<1x16xf32>,
    %c4 = arith.constant 4 : index
    %16 = memref.load %arg1[%c4] : memref<8xi32, #tpu.memory_space<smem>>
    %17 = arith.index_cast %16 : i32 to index
    %c0_12 = arith.constant 0 : index
    %18 = vector.load %arg2[%17, %c0_12] : memref<100x16xf32, #tpu.memory_space<vmem>>, vector<1x16xf32>
    %c4_13 = arith.constant 4 : index
    %c0_14 = arith.constant 0 : index
    %19 = vector.load %arg9[%c4_13, %c0_14] : memref<8x16xf32, #tpu.memory_space<vmem>>, vector<1x16xf32>
    tpu.vector_store %arg9[%c4_13, %c0_14], %18 {strides = array<i32>} : memref<8x16xf32, #tpu.memory_space<vmem>>, vector<1x16xf32>,
    %c5 = arith.constant 5 : index
    %20 = memref.load %arg1[%c5] : memref<8xi32, #tpu.memory_space<smem>>
    %21 = arith.index_cast %20 : i32 to index
    %c0_15 = arith.constant 0 : index
    %22 = vector.load %arg2[%21, %c0_15] : memref<100x16xf32, #tpu.memory_space<vmem>>, vector<1x16xf32>
    %c5_16 = arith.constant 5 : index
    %c0_17 = arith.constant 0 : index
    %23 = vector.load %arg9[%c5_16, %c0_17] : memref<8x16xf32, #tpu.memory_space<vmem>>, vector<1x16xf32>
    tpu.vector_store %arg9[%c5_16, %c0_17], %22 {strides = array<i32>} : memref<8x16xf32, #tpu.memory_space<vmem>>, vector<1x16xf32>,
    %c6 = arith.constant 6 : index
    %24 = memref.load %arg1[%c6] : memref<8xi32, #tpu.memory_space<smem>>
    %25 = arith.index_cast %24 : i32 to index
    %c0_18 = arith.constant 0 : index
    %26 = vector.load %arg2[%25, %c0_18] : memref<100x16xf32, #tpu.memory_space<vmem>>, vector<1x16xf32>
    %c6_19 = arith.constant 6 : index
    %c0_20 = arith.constant 0 : index
    %27 = vector.load %arg9[%c6_19, %c0_20] : memref<8x16xf32, #tpu.memory_space<vmem>>, vector<1x16xf32>
    tpu.vector_store %arg9[%c6_19, %c0_20], %26 {strides = array<i32>} : memref<8x16xf32, #tpu.memory_space<vmem>>, vector<1x16xf32>,
    %c7 = arith.constant 7 : index
    %28 = memref.load %arg1[%c7] : memref<8xi32, #tpu.memory_space<smem>>
    %29 = arith.index_cast %28 : i32 to index
    %c0_21 = arith.constant 0 : index
    %30 = vector.load %arg2[%29, %c0_21] : memref<100x16xf32, #tpu.memory_space<vmem>>, vector<1x16xf32>
    %c7_22 = arith.constant 7 : index
    %c0_23 = arith.constant 0 : index
    %31 = vector.load %arg9[%c7_22, %c0_23] : memref<8x16xf32, #tpu.memory_space<vmem>>, vector<1x16xf32>
    tpu.vector_store %arg9[%c7_22, %c0_23], %30 {strides = array<i32>} : memref<8x16xf32, #tpu.memory_space<vmem>>, vector<1x16xf32>,
    %c0_24 = arith.constant 0 : index
    %c0_25 = arith.constant 0 : index
    %32 = vector.load %arg9[%c0_24, %c0_25] : memref<8x16xf32, #tpu.memory_space<vmem>>, vector<8x16xf32>
    %c0_26 = arith.constant 0 : index
    %c0_27 = arith.constant 0 : index
    %33 = vector.load %arg3[%c0_26, %c0_27] : memref<16x128xf32, #tpu.memory_space<vmem>>, vector<16x128xf32>
    %c0_28 = arith.constant 0 : index
    %c0_29 = arith.constant 0 : index
    %34 = vector.load %arg4[%c0_28, %c0_29] : memref<32x128xf32, #tpu.memory_space<vmem>>, vector<32x128xf32>
    %c0_30 = arith.constant 0 : index
    %c0_31 = arith.constant 0 : index
    %35 = vector.load %arg5[%c0_30, %c0_31] : memref<1x128xf32, #tpu.memory_space<vmem>>, vector<1x128xf32>
    %cst = arith.constant dense<0.000000e+00> : vector<8x128xf32>
    %36 = tpu.matmul %32, %33, %cst {dimension_numbers = #tpu.dot_dimension_numbers<[1], [0], [0], [1], [0, 0, 1, 1], [], []>} : vector<8x16xf32>, vector<16x128xf32>, vector<8x128xf32> -> vector<8x128xf32>
    %37 = vector.broadcast %35 : vector<1x128xf32> to vector<8x128xf32>
    %38 = arith.addf %36, %37 : vector<8x128xf32>
    %cst_32 = arith.constant 0.000000e+00 : f32
    %39 = vector.broadcast %cst_32 : f32 to vector<1x32xf32>
    %cst_33 = arith.constant 0.000000e+00 : f32
    %40 = vector.broadcast %cst_33 : f32 to vector<1x32xf32>
    %41 = vector.extract_strided_slice %38 {offsets = [0, 0], sizes = [1, 128], strides = [1, 1]} : vector<8x128xf32> to vector<1x128xf32>
    %cst_34 = arith.constant dense<0.000000e+00> : vector<1x128xf32>
    %42 = tpu.matmul %39, %34, %cst_34 {dimension_numbers = #tpu.dot_dimension_numbers<[1], [0], [0], [1], [0, 0, 1, 1], [], []>} : vector<1x32xf32>, vector<32x128xf32>, vector<1x128xf32> -> vector<1x128xf32>
    %43 = arith.addf %41, %42 : vector<1x128xf32>
    %44 = arith.negf %43 : vector<1x128xf32>
    %45 = math.exp %44 : vector<1x128xf32>
    %cst_35 = arith.constant 1.000000e+00 : f32
    %46 = vector.broadcast %cst_35 : f32 to vector<1x128xf32>
    %47 = arith.addf %46, %45 : vector<1x128xf32>
    %48 = arith.divf %46, %47 : vector<1x128xf32>
    %49 = math.tanh %43 : vector<1x128xf32>
    %50 = vector.extract_strided_slice %48 {offsets = [0, 0], sizes = [1, 32], strides = [1, 1]} : vector<1x128xf32> to vector<1x32xf32>
    %51 = vector.extract_strided_slice %48 {offsets = [0, 32], sizes = [1, 32], strides = [1, 1]} : vector<1x128xf32> to vector<1x32xf32>
    %52 = vector.extract_strided_slice %49 {offsets = [0, 64], sizes = [1, 32], strides = [1, 1]} : vector<1x128xf32> to vector<1x32xf32>
    %53 = vector.extract_strided_slice %48 {offsets = [0, 96], sizes = [1, 32], strides = [1, 1]} : vector<1x128xf32> to vector<1x32xf32>
    %54 = arith.mulf %51, %40 : vector<1x32xf32>
    %55 = arith.mulf %50, %52 : vector<1x32xf32>
    %56 = arith.addf %54, %55 : vector<1x32xf32>
    %57 = math.tanh %56 : vector<1x32xf32>
    %58 = arith.mulf %53, %57 : vector<1x32xf32>
    %59 = vector.extract_strided_slice %38 {offsets = [1, 0], sizes = [1, 128], strides = [1, 1]} : vector<8x128xf32> to vector<1x128xf32>
    %cst_36 = arith.constant dense<0.000000e+00> : vector<1x128xf32>
    %60 = tpu.matmul %58, %34, %cst_36 {dimension_numbers = #tpu.dot_dimension_numbers<[1], [0], [0], [1], [0, 0, 1, 1], [], []>} : vector<1x32xf32>, vector<32x128xf32>, vector<1x128xf32> -> vector<1x128xf32>
    %61 = arith.addf %59, %60 : vector<1x128xf32>
    %62 = arith.negf %61 : vector<1x128xf32>
    %63 = math.exp %62 : vector<1x128xf32>
    %cst_37 = arith.constant 1.000000e+00 : f32
    %64 = vector.broadcast %cst_37 : f32 to vector<1x128xf32>
    %65 = arith.addf %64, %63 : vector<1x128xf32>
    %66 = arith.divf %64, %65 : vector<1x128xf32>
    %67 = math.tanh %61 : vector<1x128xf32>
    %68 = vector.extract_strided_slice %66 {offsets = [0, 0], sizes = [1, 32], strides = [1, 1]} : vector<1x128xf32> to vector<1x32xf32>
    %69 = vector.extract_strided_slice %66 {offsets = [0, 32], sizes = [1, 32], strides = [1, 1]} : vector<1x128xf32> to vector<1x32xf32>
    %70 = vector.extract_strided_slice %67 {offsets = [0, 64], sizes = [1, 32], strides = [1, 1]} : vector<1x128xf32> to vector<1x32xf32>
    %71 = vector.extract_strided_slice %66 {offsets = [0, 96], sizes = [1, 32], strides = [1, 1]} : vector<1x128xf32> to vector<1x32xf32>
    %72 = arith.mulf %69, %56 : vector<1x32xf32>
    %73 = arith.mulf %68, %70 : vector<1x32xf32>
    %74 = arith.addf %72, %73 : vector<1x32xf32>
    %75 = math.tanh %74 : vector<1x32xf32>
    %76 = arith.mulf %71, %75 : vector<1x32xf32>
    %77 = vector.extract_strided_slice %38 {offsets = [2, 0], sizes = [1, 128], strides = [1, 1]} : vector<8x128xf32> to vector<1x128xf32>
    %cst_38 = arith.constant dense<0.000000e+00> : vector<1x128xf32>
    %78 = tpu.matmul %76, %34, %cst_38 {dimension_numbers = #tpu.dot_dimension_numbers<[1], [0], [0], [1], [0, 0, 1, 1], [], []>} : vector<1x32xf32>, vector<32x128xf32>, vector<1x128xf32> -> vector<1x128xf32>
    %79 = arith.addf %77, %78 : vector<1x128xf32>
    %80 = arith.negf %79 : vector<1x128xf32>
    %81 = math.exp %80 : vector<1x128xf32>
    %cst_39 = arith.constant 1.000000e+00 : f32
    %82 = vector.broadcast %cst_39 : f32 to vector<1x128xf32>
    %83 = arith.addf %82, %81 : vector<1x128xf32>
    %84 = arith.divf %82, %83 : vector<1x128xf32>
    %85 = math.tanh %79 : vector<1x128xf32>
    %86 = vector.extract_strided_slice %84 {offsets = [0, 0], sizes = [1, 32], strides = [1, 1]} : vector<1x128xf32> to vector<1x32xf32>
    %87 = vector.extract_strided_slice %84 {offsets = [0, 32], sizes = [1, 32], strides = [1, 1]} : vector<1x128xf32> to vector<1x32xf32>
    %88 = vector.extract_strided_slice %85 {offsets = [0, 64], sizes = [1, 32], strides = [1, 1]} : vector<1x128xf32> to vector<1x32xf32>
    %89 = vector.extract_strided_slice %84 {offsets = [0, 96], sizes = [1, 32], strides = [1, 1]} : vector<1x128xf32> to vector<1x32xf32>
    %90 = arith.mulf %87, %74 : vector<1x32xf32>
    %91 = arith.mulf %86, %88 : vector<1x32xf32>
    %92 = arith.addf %90, %91 : vector<1x32xf32>
    %93 = math.tanh %92 : vector<1x32xf32>
    %94 = arith.mulf %89, %93 : vector<1x32xf32>
    %95 = vector.extract_strided_slice %38 {offsets = [3, 0], sizes = [1, 128], strides = [1, 1]} : vector<8x128xf32> to vector<1x128xf32>
    %cst_40 = arith.constant dense<0.000000e+00> : vector<1x128xf32>
    %96 = tpu.matmul %94, %34, %cst_40 {dimension_numbers = #tpu.dot_dimension_numbers<[1], [0], [0], [1], [0, 0, 1, 1], [], []>} : vector<1x32xf32>, vector<32x128xf32>, vector<1x128xf32> -> vector<1x128xf32>
    %97 = arith.addf %95, %96 : vector<1x128xf32>
    %98 = arith.negf %97 : vector<1x128xf32>
    %99 = math.exp %98 : vector<1x128xf32>
    %cst_41 = arith.constant 1.000000e+00 : f32
    %100 = vector.broadcast %cst_41 : f32 to vector<1x128xf32>
    %101 = arith.addf %100, %99 : vector<1x128xf32>
    %102 = arith.divf %100, %101 : vector<1x128xf32>
    %103 = math.tanh %97 : vector<1x128xf32>
    %104 = vector.extract_strided_slice %102 {offsets = [0, 0], sizes = [1, 32], strides = [1, 1]} : vector<1x128xf32> to vector<1x32xf32>
    %105 = vector.extract_strided_slice %102 {offsets = [0, 32], sizes = [1, 32], strides = [1, 1]} : vector<1x128xf32> to vector<1x32xf32>
    %106 = vector.extract_strided_slice %103 {offsets = [0, 64], sizes = [1, 32], strides = [1, 1]} : vector<1x128xf32> to vector<1x32xf32>
    %107 = vector.extract_strided_slice %102 {offsets = [0, 96], sizes = [1, 32], strides = [1, 1]} : vector<1x128xf32> to vector<1x32xf32>
    %108 = arith.mulf %105, %92 : vector<1x32xf32>
    %109 = arith.mulf %104, %106 : vector<1x32xf32>
    %110 = arith.addf %108, %109 : vector<1x32xf32>
    %111 = math.tanh %110 : vector<1x32xf32>
    %112 = arith.mulf %107, %111 : vector<1x32xf32>
    %113 = vector.extract_strided_slice %38 {offsets = [4, 0], sizes = [1, 128], strides = [1, 1]} : vector<8x128xf32> to vector<1x128xf32>
    %cst_42 = arith.constant dense<0.000000e+00> : vector<1x128xf32>
    %114 = tpu.matmul %112, %34, %cst_42 {dimension_numbers = #tpu.dot_dimension_numbers<[1], [0], [0], [1], [0, 0, 1, 1], [], []>} : vector<1x32xf32>, vector<32x128xf32>, vector<1x128xf32> -> vector<1x128xf32>
    %115 = arith.addf %113, %114 : vector<1x128xf32>
    %116 = arith.negf %115 : vector<1x128xf32>
    %117 = math.exp %116 : vector<1x128xf32>
    %cst_43 = arith.constant 1.000000e+00 : f32
    %118 = vector.broadcast %cst_43 : f32 to vector<1x128xf32>
    %119 = arith.addf %118, %117 : vector<1x128xf32>
    %120 = arith.divf %118, %119 : vector<1x128xf32>
    %121 = math.tanh %115 : vector<1x128xf32>
    %122 = vector.extract_strided_slice %120 {offsets = [0, 0], sizes = [1, 32], strides = [1, 1]} : vector<1x128xf32> to vector<1x32xf32>
    %123 = vector.extract_strided_slice %120 {offsets = [0, 32], sizes = [1, 32], strides = [1, 1]} : vector<1x128xf32> to vector<1x32xf32>
    %124 = vector.extract_strided_slice %121 {offsets = [0, 64], sizes = [1, 32], strides = [1, 1]} : vector<1x128xf32> to vector<1x32xf32>
    %125 = vector.extract_strided_slice %120 {offsets = [0, 96], sizes = [1, 32], strides = [1, 1]} : vector<1x128xf32> to vector<1x32xf32>
    %126 = arith.mulf %123, %110 : vector<1x32xf32>
    %127 = arith.mulf %122, %124 : vector<1x32xf32>
    %128 = arith.addf %126, %127 : vector<1x32xf32>
    %129 = math.tanh %128 : vector<1x32xf32>
    %130 = arith.mulf %125, %129 : vector<1x32xf32>
    %131 = vector.extract_strided_slice %38 {offsets = [5, 0], sizes = [1, 128], strides = [1, 1]} : vector<8x128xf32> to vector<1x128xf32>
    %cst_44 = arith.constant dense<0.000000e+00> : vector<1x128xf32>
    %132 = tpu.matmul %130, %34, %cst_44 {dimension_numbers = #tpu.dot_dimension_numbers<[1], [0], [0], [1], [0, 0, 1, 1], [], []>} : vector<1x32xf32>, vector<32x128xf32>, vector<1x128xf32> -> vector<1x128xf32>
    %133 = arith.addf %131, %132 : vector<1x128xf32>
    %134 = arith.negf %133 : vector<1x128xf32>
    %135 = math.exp %134 : vector<1x128xf32>
    %cst_45 = arith.constant 1.000000e+00 : f32
    %136 = vector.broadcast %cst_45 : f32 to vector<1x128xf32>
    %137 = arith.addf %136, %135 : vector<1x128xf32>
    %138 = arith.divf %136, %137 : vector<1x128xf32>
    %139 = math.tanh %133 : vector<1x128xf32>
    %140 = vector.extract_strided_slice %138 {offsets = [0, 0], sizes = [1, 32], strides = [1, 1]} : vector<1x128xf32> to vector<1x32xf32>
    %141 = vector.extract_strided_slice %138 {offsets = [0, 32], sizes = [1, 32], strides = [1, 1]} : vector<1x128xf32> to vector<1x32xf32>
    %142 = vector.extract_strided_slice %139 {offsets = [0, 64], sizes = [1, 32], strides = [1, 1]} : vector<1x128xf32> to vector<1x32xf32>
    %143 = vector.extract_strided_slice %138 {offsets = [0, 96], sizes = [1, 32], strides = [1, 1]} : vector<1x128xf32> to vector<1x32xf32>
    %144 = arith.mulf %141, %128 : vector<1x32xf32>
    %145 = arith.mulf %140, %142 : vector<1x32xf32>
    %146 = arith.addf %144, %145 : vector<1x32xf32>
    %147 = math.tanh %146 : vector<1x32xf32>
    %148 = arith.mulf %143, %147 : vector<1x32xf32>
    %149 = vector.extract_strided_slice %38 {offsets = [6, 0], sizes = [1, 128], strides = [1, 1]} : vector<8x128xf32> to vector<1x128xf32>
    %cst_46 = arith.constant dense<0.000000e+00> : vector<1x128xf32>
    %150 = tpu.matmul %148, %34, %cst_46 {dimension_numbers = #tpu.dot_dimension_numbers<[1], [0], [0], [1], [0, 0, 1, 1], [], []>} : vector<1x32xf32>, vector<32x128xf32>, vector<1x128xf32> -> vector<1x128xf32>
    %151 = arith.addf %149, %150 : vector<1x128xf32>
    %152 = arith.negf %151 : vector<1x128xf32>
    %153 = math.exp %152 : vector<1x128xf32>
    %cst_47 = arith.constant 1.000000e+00 : f32
    %154 = vector.broadcast %cst_47 : f32 to vector<1x128xf32>
    %155 = arith.addf %154, %153 : vector<1x128xf32>
    %156 = arith.divf %154, %155 : vector<1x128xf32>
    %157 = math.tanh %151 : vector<1x128xf32>
    %158 = vector.extract_strided_slice %156 {offsets = [0, 0], sizes = [1, 32], strides = [1, 1]} : vector<1x128xf32> to vector<1x32xf32>
    %159 = vector.extract_strided_slice %156 {offsets = [0, 32], sizes = [1, 32], strides = [1, 1]} : vector<1x128xf32> to vector<1x32xf32>
    %160 = vector.extract_strided_slice %157 {offsets = [0, 64], sizes = [1, 32], strides = [1, 1]} : vector<1x128xf32> to vector<1x32xf32>
    %161 = vector.extract_strided_slice %156 {offsets = [0, 96], sizes = [1, 32], strides = [1, 1]} : vector<1x128xf32> to vector<1x32xf32>
    %162 = arith.mulf %159, %146 : vector<1x32xf32>
    %163 = arith.mulf %158, %160 : vector<1x32xf32>
    %164 = arith.addf %162, %163 : vector<1x32xf32>
    %165 = math.tanh %164 : vector<1x32xf32>
    %166 = arith.mulf %161, %165 : vector<1x32xf32>
    %167 = vector.extract_strided_slice %38 {offsets = [7, 0], sizes = [1, 128], strides = [1, 1]} : vector<8x128xf32> to vector<1x128xf32>
    %cst_48 = arith.constant dense<0.000000e+00> : vector<1x128xf32>
    %168 = tpu.matmul %166, %34, %cst_48 {dimension_numbers = #tpu.dot_dimension_numbers<[1], [0], [0], [1], [0, 0, 1, 1], [], []>} : vector<1x32xf32>, vector<32x128xf32>, vector<1x128xf32> -> vector<1x128xf32>
    %169 = arith.addf %167, %168 : vector<1x128xf32>
    %170 = arith.negf %169 : vector<1x128xf32>
    %171 = math.exp %170 : vector<1x128xf32>
    %cst_49 = arith.constant 1.000000e+00 : f32
    %172 = vector.broadcast %cst_49 : f32 to vector<1x128xf32>
    %173 = arith.addf %172, %171 : vector<1x128xf32>
    %174 = arith.divf %172, %173 : vector<1x128xf32>
    %175 = math.tanh %169 : vector<1x128xf32>
    %176 = vector.extract_strided_slice %174 {offsets = [0, 0], sizes = [1, 32], strides = [1, 1]} : vector<1x128xf32> to vector<1x32xf32>
    %177 = vector.extract_strided_slice %174 {offsets = [0, 32], sizes = [1, 32], strides = [1, 1]} : vector<1x128xf32> to vector<1x32xf32>
    %178 = vector.extract_strided_slice %175 {offsets = [0, 64], sizes = [1, 32], strides = [1, 1]} : vector<1x128xf32> to vector<1x32xf32>
    %179 = vector.extract_strided_slice %174 {offsets = [0, 96], sizes = [1, 32], strides = [1, 1]} : vector<1x128xf32> to vector<1x32xf32>
    %180 = arith.mulf %177, %164 : vector<1x32xf32>
    %181 = arith.mulf %176, %178 : vector<1x32xf32>
    %182 = arith.addf %180, %181 : vector<1x32xf32>
    %183 = math.tanh %182 : vector<1x32xf32>
    %184 = arith.mulf %179, %183 : vector<1x32xf32>
    %c0_50 = arith.constant 0 : index
    %c0_51 = arith.constant 0 : index
    %185 = vector.load %arg6[%c0_50, %c0_51] : memref<32x4xf32, #tpu.memory_space<vmem>>, vector<32x4xf32>
    %cst_52 = arith.constant dense<0.000000e+00> : vector<1x4xf32>
    %186 = tpu.matmul %184, %185, %cst_52 {dimension_numbers = #tpu.dot_dimension_numbers<[1], [0], [0], [1], [0, 0, 1, 1], [], []>} : vector<1x32xf32>, vector<32x4xf32>, vector<1x4xf32> -> vector<1x4xf32>
    %c0_53 = arith.constant 0 : index
    %c0_54 = arith.constant 0 : index
    %187 = vector.load %arg7[%c0_53, %c0_54] : memref<1x4xf32, #tpu.memory_space<vmem>>, vector<1x4xf32>
    %188 = arith.addf %186, %187 : vector<1x4xf32>
    %cst_55 = arith.constant 0.000000e+00 : f32
    %189 = vector.broadcast %cst_55 : f32 to vector<1x4xf32>
    %190 = arith.maximumf %188, %189 : vector<1x4xf32>
    %cst_56 = arith.constant dense<0xFF800000> : vector<1xf32>
    %191 = vector.multi_reduction <maximumf>, %190, %cst_56 [1] : vector<1x4xf32> to vector<1xf32>
    %192 = vector.shape_cast %191 : vector<1xf32> to vector<1x1xf32>
    %193 = vector.broadcast %192 : vector<1x1xf32> to vector<1x4xf32>
    %194 = arith.subf %190, %193 : vector<1x4xf32>
    %195 = math.exp %194 : vector<1x4xf32>
    %cst_57 = arith.constant dense<0.000000e+00> : vector<1xf32>
    %196 = vector.multi_reduction <add>, %195, %cst_57 [1] : vector<1x4xf32> to vector<1xf32>
    %197 = vector.shape_cast %196 : vector<1xf32> to vector<1x1xf32>
    %198 = math.log %197 : vector<1x1xf32>
    %199 = vector.broadcast %198 : vector<1x1xf32> to vector<1x4xf32>
    %200 = arith.subf %194, %199 : vector<1x4xf32>
    %c0_58 = arith.constant 0 : index
    %c0_59 = arith.constant 0 : index
    %201 = vector.load %arg8[%c0_58, %c0_59] : memref<1x4xf32, #tpu.memory_space<vmem>>, vector<1x4xf32>
    tpu.vector_store %arg8[%c0_58, %c0_59], %200 {strides = array<i32>} : memref<1x4xf32, #tpu.memory_space<vmem>>, vector<1x4xf32>,
    return
  }
  func.func @transform_0(%arg0: i32, %arg1: memref<8xi32, #tpu.memory_space<smem>>) -> (i32, i32) {
    %c0_i32 = arith.constant 0 : i32
    %c0_i32_0 = arith.constant 0 : i32
    %c0_i32_1 = arith.constant 0 : i32
    return %c0_i32, %c0_i32_0 : i32, i32
  }
  func.func @transform_1(%arg0: i32, %arg1: memref<8xi32, #tpu.memory_space<smem>>) -> (i32, i32) {
    %c0_i32 = arith.constant 0 : i32
    %c0_i32_0 = arith.constant 0 : i32
    %c0_i32_1 = arith.constant 0 : i32
    return %c0_i32, %c0_i32_0 : i32, i32
  }
  func.func @transform_2(%arg0: i32, %arg1: memref<8xi32, #tpu.memory_space<smem>>) -> (i32, i32) {
    %c0_i32 = arith.constant 0 : i32
    %c0_i32_0 = arith.constant 0 : i32
    %c0_i32_1 = arith.constant 0 : i32
    return %c0_i32, %c0_i32_0 : i32, i32
  }
  func.func @transform_3(%arg0: i32, %arg1: memref<8xi32, #tpu.memory_space<smem>>) -> (i32, i32) {
    %c0_i32 = arith.constant 0 : i32
    %c0_i32_0 = arith.constant 0 : i32
    %c0_i32_1 = arith.constant 0 : i32
    return %c0_i32, %c0_i32_0 : i32, i32
  }
  func.func @transform_4(%arg0: i32, %arg1: memref<8xi32, #tpu.memory_space<smem>>) -> (i32, i32) {
    %c0_i32 = arith.constant 0 : i32
    %c0_i32_0 = arith.constant 0 : i32
    %c0_i32_1 = arith.constant 0 : i32
    return %c0_i32, %c0_i32_0 : i32, i32
  }
  func.func @transform_5(%arg0: i32, %arg1: memref<8xi32, #tpu.memory_space<smem>>) -> (i32, i32) {
    %c0_i32 = arith.constant 0 : i32
    %c0_i32_0 = arith.constant 0 : i32
    %c0_i32_1 = arith.constant 0 : i32
    return %c0_i32, %c0_i32_0 : i32, i32
  }
  func.func @transform_6(%arg0: i32, %arg1: memref<8xi32, #tpu.memory_space<smem>>) -> (i32, i32) {
    %c0_i32 = arith.constant 0 : i32
    %c0_i32_0 = arith.constant 0 : i32
    %c0_i32_1 = arith.constant 0 : i32
    return %c0_i32, %c0_i32_0 : i32, i32
  }
}

</mosaic_0001>

<bundles_post_ra>
// kernel: lstm_sentiment_forward.1
= control target key start
LH: loop header
LB: loop body
LE: loop exit
PB: predicated region body
PF: predicated region fallthrough
CT: control target
= control target key end

     0   :  { %s1712_s0 = inlined_call_operand.vmem [shape: s32[8], index: 0, kind: input, shape index: {}]   ;;  %s1713_s1 = inlined_call_operand.vmem [shape: f32[100,16], index: 1, kind: input, shape index: {}]   ;;  %s1714_s2 = inlined_call_operand.vmem [shape: f32[16,128], index: 2, kind: input, shape index: {}]   ;;  %s1715_s3 = inlined_call_operand.vmem [shape: f32[32,128], index: 3, kind: input, shape index: {}]   ;;  %s1716_s4 = inlined_call_operand.vmem [shape: f32[1,128], index: 4, kind: input, shape index: {}]   ;;  %s1717_s5 = inlined_call_operand.vmem [shape: f32[32,4], index: 5, kind: input, shape index: {}]   ;;  %s1718_s6 = inlined_call_operand.vmem [shape: f32[1,4], index: 6, kind: input, shape index: {}]   ;;  %s1719_s7 = inlined_call_operand.hbm [shape: f32[1,4], index: 7, kind: output, shape index: {}]  }
   0x1   :  { %s12_s26 = sshll.u32 %s1712_s0, 4  ;;  %s13_s26 = int_to_ptr.vmem [resolvable:$true] %s12_s26 }
   0x2   :  { %s1428_s27 = scalar_lea.vmem %s13_s26, 16  ;;  %p1433_p1 = scmp.lt.s32.totalorder %s13_s26, %s13_s26 }
   0x3   :  { %p1429_p0 = scmp.ne.s32.totalorder %s13_s26, %s1428_s27  ;;  %p1434_p2 = scmp.lt.s32.totalorder %s1428_s27, %s1428_s27 }
   0x5   :  { %p1435_p3 = por %p1434_p2, %p1433_p1 }
   0x7   :  { %p1436_p4 = pnand %p1435_p3, %p1429_p0 }
   0x9   :  { %1439 = shalt.err (!%p1436_p4)  }
   0xa   :  { %s1466_s28 = smov [#allocation4]  }
   0xb   :  { %15 = dma.vmem_to_smem %s13_s26, 16, %s1466_s28, [#allocation3] }
   0xc   :  { %1462 = dma.done.wait [#allocation3], 16 }
   0xd   :  { %1463 = vsyncadd [#allocation3], 4294967280 }
   0xe   :  { %17 = sfence }
   0xf   :  { %v67_v0 = vld [vmem:[%s1715_s3] sm:$0xff]  ;;  %v68_v1 = vld [vmem:[%s1715_s3 + $0x8] sm:$0xff]  ;;  %v1467_v3 = vmov 0.0|0.0   ;;  %v69_v6 = vld [vmem:[%s1715_s3 + $0x10] sm:$0xff]  ;;  %s31_s17 = sld [smem:[#allocation4]]  ;;  %vm1468_vm0 = vmmov 0  }
  0x10   :  { %v65_v2 = vld [vmem:[%s1714_s2] sm:$0xff]  ;;  %1299 = vmatprep.subr.bf16.mxu1 %v1467_v3  ;;  %v1526_v4 = vpack.c.bf16 %v68_v1, %v67_v0  ;;  %1296 = vmatprep.subr.bf16.mxu0 %v1467_v3  ;;  %v66_v5 = vld [vmem:[%s1714_s2 + $0x8] sm:$0xff]  ;;  %v70_v7 = vld [vmem:[%s1715_s3 + $0x18] sm:$0xff]  ;;  %v1469_v9 = vmov 0.0   ;;  %s1117_s18 = sld [smem:[#allocation4 + $0x1]]  ;;  %s1118_s19 = sld [smem:[#allocation4 + $0x2]] }
  0x11   :  { %v1297_v8 = vpack.c.bf16 %v66_v5, %v65_v2  ;;  %1194 = vmatprep.mubr.msk.f32.mxu0 %vm1468_vm0, %v1469_v9  ;;  %1205 = vmatprep.mubr.msk.f32.mxu1 %vm1468_vm0, %v1469_v9  ;;  %v1543_v10 = vpack.c.bf16 %v70_v7, %v69_v6  ;;  %s1119_s2 = sld [smem:[#allocation4 + $0x3]]  ;;  %s1120_s20 = sld [smem:[#allocation4 + $0x4]] }
  0x12   :  { %1301 = vmatpush3.bf16.msra.mxu1 %v1526_v4  ;;  %s1121_s3 = sld [smem:[#allocation4 + $0x5]]  ;;  %s1122_s21 = sld [smem:[#allocation4 + $0x6]] }
  0x13   :  { %1298 = vmatpush3.bf16.msra.mxu0 %v1297_v8  ;;  %1302 = vmatprep.subr.bf16.mxu1 %v1467_v3 }
  0x14   :  { %18 = vsyncpa [#allocation6], 0  ;;  %s1546_s22 = sld [smem:[#allocation4 + $0x7]]  ;;  %1305 = vmatprep.subr.bf16.mxu0 %v1467_v3  ;;  %vm34_vm1 = vcmask 122880   ;;  %vm78_vm2 = vcmask 130048   ;;  %vm152_vm3 = vcmask 261120  }
  0x15   :  { %s32_s25 = scalar_lea.vmem %s1713_s1, %s31_s17  ;;  %v1124_v22 = vld [vmem:[%s1716_s4] ss:$0 sm:$0xff]  ;;  %s1471_s4 = smov 32   ;;  %vm1081_vm4 = vcmask 24576  }
  0x16   :  { %1304 = vmatpush3.bf16.msra.mxu1 %v1543_v10  ;;  %v33_v11 = vld [vmem:[%s32_s25] sm:$0x1]  ;;  %s37_s28 = scalar_lea.vmem %s1713_s1, %s1117_s18  ;;  %s41_s8 = scalar_lea.vmem %s1713_s1, %s1118_s19 }
  0x17   :  { %1311 = vmatprep.subr.bf16.mxu1 %v1467_v3  ;;  %35 = vst.msk [vmem:[#allocation2] sm:$0x1] %vm34_vm1, %v33_v11  ;;  %v38_v12 = vld [vmem:[%s37_s28] sm:$0x1]  ;;  %s45_s10 = scalar_lea.vmem %s1713_s1, %s1119_s2  ;;  %s49_s13 = scalar_lea.vmem %s1713_s1, %s1120_s20 }
  0x18   :  { %v42_v13 = vld [vmem:[%s41_s8] sm:$0x1]  ;;  %39 = vst.msk [vmem:[#allocation2 + $0x1] sm:$0x1] %vm34_vm1, %v38_v12  ;;  %s53_s16 = scalar_lea.vmem %s1713_s1, %s1121_s3  ;;  %s57_s19 = scalar_lea.vmem %s1713_s1, %s1122_s21 }
  0x19   :  { %43 = vst.msk [vmem:[#allocation2 + $0x2] sm:$0x1] %vm34_vm1, %v42_v13  ;;  %v46_v14 = vld [vmem:[%s45_s10] sm:$0x1]  ;;  %1206 = vmatmul.mubr.f32.vlgmr.msra.gmra.mrb[0].mxu1 %v1469_v9  ;;  %s1470_s21 = smov 64  }
  0x1a   :  { %v50_v15 = vld [vmem:[%s49_s13] sm:$0x1]  ;;  %47 = vst.msk [vmem:[#allocation2 + $0x3] sm:$0x1] %vm34_vm1, %v46_v14  ;;  %s61_s23 = scalar_lea.vmem %s1713_s1, %s1546_s22  ;;  %1313 = vmatpush3.bf16.msra.mxu1 %v1526_v4  ;;  %1227 = vmatprep.mubr.msk.f32.mxu1 %vm1468_vm0, %v1469_v9 }
  0x1b   :  { %51 = vst.msk [vmem:[#allocation2 + $0x4] sm:$0x1] %vm34_vm1, %v50_v15  ;;  %v54_v16 = vld [vmem:[%s53_s16] sm:$0x1]  ;;  %1314 = vmatprep.subr.bf16.mxu1 %v1467_v3 }
  0x1c   :  { %v58_v17 = vld [vmem:[%s57_s19] sm:$0x1]  ;;  %55 = vst.msk [vmem:[#allocation2 + $0x5] sm:$0x1] %vm34_vm1, %v54_v16 }
  0x1d   :  { %59 = vst.msk [vmem:[#allocation2 + $0x6] sm:$0x1] %vm34_vm1, %v58_v17  ;;  %v62_v18 = vld [vmem:[%s61_s23] sm:$0x1] }
  0x1e   :  { %63 = vst.msk [vmem:[#allocation2 + $0x7] sm:$0x1] %vm34_vm1, %v62_v18  ;;  %1316 = vmatpush3.bf16.msra.mxu1 %v1543_v10 }
  0x1f   :  { %1323 = vmatprep.subr.bf16.mxu1 %v1467_v3 }
  0x25   :  { %v64_v19 = vld [vmem:[#allocation2] sm:$0xff] }
  0x26   :  { %1195 = vmatmul.mubr.msk.f32.vlgmr.msra.gmra.mrb[0].mxu0 %vm78_vm2, %v64_v19 }
  0x27   :  { %1307 = vmatpush3.bf16.msra.mxu0 %v1526_v4  ;;  %1216 = vmatprep.mubr.msk.f32.mxu0 %vm1468_vm0, %v1469_v9 }
  0x28   :  { %1308 = vmatprep.subr.bf16.mxu0 %v1467_v3 }
  0x2b   :  { %1310 = vmatpush3.bf16.msra.mxu0 %v1543_v10 }
  0x2c   :  { %1317 = vmatprep.subr.bf16.mxu0 %v1467_v3 }
  0xec   :  { %v222_v20 = vpop.f32.mrb[0].mxu1 }
  0xed   :  { %v1207_v21 = vpop.f32.mrb[1].mxu1 }
  0xf9   :  { %v148_v23 = vpop.f32.mrb[0].mxu0 }
  0xfa   :  { %v1600_v24 = vadd.f32 %v1124_v22, %v148_v23  ;;  %v1196_v25 = vpop.f32.mrb[1].mxu0 }
  0xfc   :  { %v226_v26 = vadd.f32 %v222_v20, %v1600_v24 }
  0xfe   :  { %1360 = vtanh.f32 %v226_v26  ;;  %v1126_v28 = vmul.f32 -1.442695, %v226_v26 }
 0x100   :  { %1362 = vpow2.f32 %v1126_v28 }
 0x108   :  { %v1361_v27 = vpop.eup %1360 }
 0x109   :  { %236 = vrot.lane.b32.xlu0 %v1361_v27, %s1470_s21 }
 0x10a   :  { %v1363_v29 = vpop.eup %1362 }
 0x10b   :  { %v230_v30 = vadd.f32 1.0, %v1363_v29 }
 0x10d   :  { %1364 = vrcp.f32 %v230_v30 }
 0x117   :  { %v1365_v31 = vpop.eup %1364 }
 0x118   :  { %v234_v34 = vmul.f32 0.0, %v1365_v31 }
 0x17b   :  { %v237_v32 = vpop.permute.xlu0 %236 }
 0x17c   :  { %v239_v33 = vmul.f32 %v1365_v31, %v237_v32 }
 0x17e   :  { %241 = vrot.lane.b32.xlu0 %v239_v33, %s1471_s4 }
 0x1f0   :  { %v242_v35 = vpop.permute.xlu0 %241 }
 0x1f1   :  { %v244_v36 = vadd.f32 %v242_v35, %v234_v34 }
 0x1f3   :  { %1366 = vtanh.f32 %v244_v36  ;;  %v338_v52 = vrot.slane %v244_v36, 7 }
 0x1fd   :  { %v1367_v37 = vpop.eup %1366 }
 0x1fe   :  { %247 = vrot.lane.b32.xlu1 %v1367_v37, %s1470_s21 }
 0x270   :  { %v248_v38 = vpop.permute.xlu1 %247 }
 0x271   :  { %v250_v39 = vmul.f32 %v1365_v31, %v248_v38 }
 0x273   :  { %252 = vrot.lane.b32.xlu1 %v250_v39, %s1471_s4 }
 0x2e5   :  { %v253_v40 = vpop.permute.xlu1 %252 }
 0x2e6   :  { %1217 = vmatmul.mubr.msk.f32.vlgmr.msra.gmra.mrb[2].mxu0 %vm152_vm3, %v253_v40 }
 0x2e7   :  { %1319 = vmatpush3.bf16.msra.mxu0 %v1526_v4  ;;  %1238 = vmatprep.mubr.msk.f32.mxu0 %vm1468_vm0, %v1469_v9 }
 0x2e8   :  { %1320 = vmatprep.subr.bf16.mxu0 %v1467_v3 }
 0x2eb   :  { %1322 = vmatpush3.bf16.msra.mxu0 %v1543_v10 }
 0x2ec   :  { %1329 = vmatprep.subr.bf16.mxu0 %v1467_v3 }
 0x3b9   :  { %v322_v41 = vpop.f32.mrb[2].mxu0 }
 0x3ba   :  { %v327_v42 = vrot.slane %v322_v41, 7  ;;  %v1218_v43 = vpop.f32.mrb[3].mxu0 }
 0x3bc   :  { %v329_v44 = vadd.f32 %v327_v42, %v1600_v24 }
 0x3be   :  { %1368 = vtanh.f32 %v329_v44  ;;  %v1128_v46 = vmul.f32 -1.442695, %v329_v44 }
 0x3c0   :  { %1370 = vpow2.f32 %v1128_v46 }
 0x3c8   :  { %v1369_v45 = vpop.eup %1368 }
 0x3c9   :  { %342 = vrot.lane.b32.xlu0 %v1369_v45, %s1470_s21 }
 0x3ca   :  { %v1371_v47 = vpop.eup %1370 }
 0x3cb   :  { %v333_v48 = vadd.f32 1.0, %v1371_v47 }
 0x3cd   :  { %1372 = vrcp.f32 %v333_v48 }
 0x3d7   :  { %v1373_v49 = vpop.eup %1372 }
 0x3d8   :  { %v340_v53 = vmul.f32 %v1373_v49, %v338_v52 }
 0x43b   :  { %v343_v50 = vpop.permute.xlu0 %342 }
 0x43c   :  { %v345_v51 = vmul.f32 %v1373_v49, %v343_v50 }
 0x43e   :  { %347 = vrot.lane.b32.xlu1 %v345_v51, %s1471_s4 }
 0x4b0   :  { %v348_v54 = vpop.permute.xlu1 %347 }
 0x4b1   :  { %v350_v55 = vadd.f32 %v348_v54, %v340_v53 }
 0x4b3   :  { %1374 = vtanh.f32 %v350_v55  ;;  %v445_v12 = vrot.slane %v350_v55, 7 }
 0x4bd   :  { %v1375_v56 = vpop.eup %1374 }
 0x4be   :  { %353 = vrot.lane.b32.xlu0 %v1375_v56, %s1470_s21 }
 0x530   :  { %v354_v57 = vpop.permute.xlu0 %353 }
 0x531   :  { %v356_v58 = vmul.f32 %v1373_v49, %v354_v57 }
 0x533   :  { %v358_v59 = vrot.slane %v356_v58, 1 }
 0x535   :  { %359 = vrot.lane.b32.xlu1 %v358_v59, %s1471_s4 }
 0x5a7   :  { %v360_v60 = vpop.permute.xlu1 %359 }
 0x5a8   :  { %1228 = vmatmul.mubr.msk.f32.vlgmr.msra.gmra.mrb[2].mxu1 %vm152_vm3, %v360_v60 }
 0x5a9   :  { %1325 = vmatpush3.bf16.msra.mxu1 %v1526_v4  ;;  %1249 = vmatprep.mubr.msk.f32.mxu1 %vm1468_vm0, %v1469_v9 }
 0x5aa   :  { %1326 = vmatprep.subr.bf16.mxu1 %v1467_v3 }
 0x5ad   :  { %1328 = vmatpush3.bf16.msra.mxu1 %v1543_v10 }
 0x5ae   :  { %1335 = vmatprep.subr.bf16.mxu1 %v1467_v3 }
 0x67b   :  { %v429_v61 = vpop.f32.mrb[2].mxu1 }
 0x67c   :  { %v434_v62 = vrot.slane %v429_v61, 6  ;;  %v1229_v63 = vpop.f32.mrb[3].mxu1 }
 0x67e   :  { %v436_v0 = vadd.f32 %v434_v62, %v1600_v24 }
 0x680   :  { %1376 = vtanh.f32 %v436_v0  ;;  %v1130_v2 = vmul.f32 -1.442695, %v436_v0 }
 0x682   :  { %1378 = vpow2.f32 %v1130_v2 }
 0x68a   :  { %v1377_v1 = vpop.eup %1376 }
 0x68b   :  { %449 = vrot.lane.b32.xlu0 %v1377_v1, %s1470_s21 }
 0x68c   :  { %v1379_v5 = vpop.eup %1378 }
 0x68d   :  { %v440_v6 = vadd.f32 1.0, %v1379_v5 }
 0x68f   :  { %1380 = vrcp.f32 %v440_v6 }
 0x699   :  { %v1381_v7 = vpop.eup %1380 }
 0x69a   :  { %v447_v13 = vmul.f32 %v1381_v7, %v445_v12 }
 0x6fd   :  { %v450_v8 = vpop.permute.xlu0 %449 }
 0x6fe   :  { %v452_v11 = vmul.f32 %v1381_v7, %v450_v8 }
 0x700   :  { %454 = vrot.lane.b32.xlu1 %v452_v11, %s1471_s4 }
 0x772   :  { %v455_v14 = vpop.permute.xlu1 %454 }
 0x773   :  { %v457_v15 = vadd.f32 %v455_v14, %v447_v13 }
 0x775   :  { %1382 = vtanh.f32 %v457_v15  ;;  %v552_v33 = vrot.slane %v457_v15, 7 }
 0x77f   :  { %v1383_v16 = vpop.eup %1382 }
 0x780   :  { %460 = vrot.lane.b32.xlu0 %v1383_v16, %s1470_s21 }
 0x7f2   :  { %v461_v17 = vpop.permute.xlu0 %460 }
 0x7f3   :  { %v463_v18 = vmul.f32 %v1381_v7, %v461_v17 }
 0x7f5   :  { %v465_v19 = vrot.slane %v463_v18, 2 }
 0x7f7   :  { %466 = vrot.lane.b32.xlu1 %v465_v19, %s1471_s4 }
 0x869   :  { %v467_v20 = vpop.permute.xlu1 %466 }
 0x86a   :  { %1239 = vmatmul.mubr.msk.f32.vlgmr.msra.gmra.mrb[4].mxu0 %vm152_vm3, %v467_v20 }
 0x86b   :  { %1331 = vmatpush3.bf16.msra.mxu0 %v1526_v4  ;;  %1260 = vmatprep.mubr.msk.f32.mxu0 %vm1468_vm0, %v1469_v9 }
 0x86c   :  { %1332 = vmatprep.subr.bf16.mxu0 %v1467_v3 }
 0x86f   :  { %1334 = vmatpush3.bf16.msra.mxu0 %v1543_v10 }
 0x870   :  { %1341 = vmatprep.subr.bf16.mxu0 %v1467_v3 }
 0x93d   :  { %v536_v21 = vpop.f32.mrb[4].mxu0 }
 0x93e   :  { %v541_v22 = vrot.slane %v536_v21, 5  ;;  %v1240_v23 = vpop.f32.mrb[5].mxu0 }
 0x940   :  { %v543_v25 = vadd.f32 %v541_v22, %v1600_v24 }
 0x942   :  { %1384 = vtanh.f32 %v543_v25  ;;  %v1132_v27 = vmul.f32 -1.442695, %v543_v25 }
 0x944   :  { %1386 = vpow2.f32 %v1132_v27 }
 0x94c   :  { %v1385_v26 = vpop.eup %1384 }
 0x94d   :  { %556 = vrot.lane.b32.xlu0 %v1385_v26, %s1470_s21 }
 0x94e   :  { %v1387_v28 = vpop.eup %1386 }
 0x94f   :  { %v547_v29 = vadd.f32 1.0, %v1387_v28 }
 0x951   :  { %1388 = vrcp.f32 %v547_v29 }
 0x95b   :  { %v1389_v30 = vpop.eup %1388 }
 0x95c   :  { %v554_v34 = vmul.f32 %v1389_v30, %v552_v33 }
 0x9bf   :  { %v557_v31 = vpop.permute.xlu0 %556 }
 0x9c0   :  { %v559_v32 = vmul.f32 %v1389_v30, %v557_v31 }
 0x9c2   :  { %561 = vrot.lane.b32.xlu1 %v559_v32, %s1471_s4 }
 0xa34   :  { %v562_v35 = vpop.permute.xlu1 %561 }
 0xa35   :  { %v564_v36 = vadd.f32 %v562_v35, %v554_v34 }
 0xa37   :  { %1390 = vtanh.f32 %v564_v36  ;;  %v659_v53 = vrot.slane %v564_v36, 7 }
 0xa41   :  { %v1391_v37 = vpop.eup %1390 }
 0xa42   :  { %567 = vrot.lane.b32.xlu0 %v1391_v37, %s1470_s21 }
 0xab4   :  { %v568_v38 = vpop.permute.xlu0 %567 }
 0xab5   :  { %v570_v39 = vmul.f32 %v1389_v30, %v568_v38 }
 0xab7   :  { %v572_v40 = vrot.slane %v570_v39, 3 }
 0xab9   :  { %573 = vrot.lane.b32.xlu1 %v572_v40, %s1471_s4 }
 0xb2b   :  { %v574_v41 = vpop.permute.xlu1 %573 }
 0xb2c   :  { %1250 = vmatmul.mubr.msk.f32.vlgmr.msra.gmra.mrb[4].mxu1 %vm152_vm3, %v574_v41 }
 0xb2d   :  { %1337 = vmatpush3.bf16.msra.mxu1 %v1526_v4  ;;  %1271 = vmatprep.mubr.msk.f32.mxu1 %vm1468_vm0, %v1469_v9 }
 0xb2e   :  { %1338 = vmatprep.subr.bf16.mxu1 %v1467_v3 }
 0xb31   :  { %1340 = vmatpush3.bf16.msra.mxu1 %v1543_v10 }
 0xb32   :  { %1347 = vmatprep.subr.bf16.mxu1 %v1467_v3 }
 0xbff   :  { %v643_v42 = vpop.f32.mrb[4].mxu1 }
 0xc00   :  { %v648_v43 = vrot.slane %v643_v42, 4  ;;  %v1251_v44 = vpop.f32.mrb[5].mxu1 }
 0xc02   :  { %v650_v45 = vadd.f32 %v648_v43, %v1600_v24 }
 0xc04   :  { %1392 = vtanh.f32 %v650_v45  ;;  %v1134_v47 = vmul.f32 -1.442695, %v650_v45 }
 0xc06   :  { %1394 = vpow2.f32 %v1134_v47 }
 0xc0e   :  { %v1393_v46 = vpop.eup %1392 }
 0xc0f   :  { %663 = vrot.lane.b32.xlu0 %v1393_v46, %s1470_s21 }
 0xc10   :  { %v1395_v48 = vpop.eup %1394 }
 0xc11   :  { %v654_v49 = vadd.f32 1.0, %v1395_v48 }
 0xc13   :  { %1396 = vrcp.f32 %v654_v49 }
 0xc1d   :  { %v1397_v50 = vpop.eup %1396 }
 0xc1e   :  { %v661_v54 = vmul.f32 %v1397_v50, %v659_v53 }
 0xc81   :  { %v664_v51 = vpop.permute.xlu0 %663 }
 0xc82   :  { %v666_v52 = vmul.f32 %v1397_v50, %v664_v51 }
 0xc84   :  { %668 = vrot.lane.b32.xlu1 %v666_v52, %s1471_s4 }
 0xcf6   :  { %v669_v55 = vpop.permute.xlu1 %668 }
 0xcf7   :  { %v671_v56 = vadd.f32 %v669_v55, %v661_v54  ;;  %v1000_v55 = vld [vmem:[%s1717_s5 + $0x8] sm:$0xff] }
 0xcf9   :  { %1398 = vtanh.f32 %v671_v56 }
 0xd03   :  { %v1399_v57 = vpop.eup %1398 }
 0xd04   :  { %674 = vrot.lane.b32.xlu0 %v1399_v57, %s1470_s21 }
 0xd76   :  { %v675_v58 = vpop.permute.xlu0 %674 }
 0xd77   :  { %v677_v59 = vmul.f32 %v1397_v50, %v675_v58  ;;  %v1002_v58 = vld [vmem:[%s1717_s5 + $0x18] sm:$0xff] }
 0xd79   :  { %v679_v60 = vrot.slane %v677_v59, 4 }
 0xd7b   :  { %680 = vrot.lane.b32.xlu1 %v679_v60, %s1471_s4 }
 0xded   :  { %v681_v61 = vpop.permute.xlu1 %680 }
 0xdee   :  { %1261 = vmatmul.mubr.msk.f32.vlgmr.msra.gmra.mrb[6].mxu0 %vm152_vm3, %v681_v61 }
 0xdef   :  { %1343 = vmatpush3.bf16.msra.mxu0 %v1526_v4  ;;  %1282 = vmatprep.mubr.msk.f32.mxu0 %vm1468_vm0, %v1469_v9 }
 0xdf0   :  { %1344 = vmatprep.subr.bf16.mxu0 %v1467_v3 }
 0xdf3   :  { %1346 = vmatpush3.bf16.msra.mxu0 %v1543_v10  ;;  %v766_v10 = vrot.slane %v671_v56, 7  ;;  %v1001_v56 = vld [vmem:[%s1717_s5 + $0x10] sm:$0xff] }
 0xdf4   :  { %v1351_v59 = vpack.c.bf16 %v1002_v58, %v1001_v56 }
 0xec1   :  { %v750_v62 = vpop.f32.mrb[6].mxu0 }
 0xec2   :  { %v755_v63 = vrot.slane %v750_v62, 3  ;;  %v1262_v0 = vpop.f32.mrb[7].mxu0 }
 0xec4   :  { %v757_v1 = vadd.f32 %v755_v63, %v1600_v24 }
 0xec6   :  { %1400 = vtanh.f32 %v757_v1  ;;  %v1136_v5 = vmul.f32 -1.442695, %v757_v1  ;;  %v1003_v1 = vld [vmem:[%s1718_s6] sm:$0x1] }
 0xec8   :  { %1402 = vpow2.f32 %v1136_v5 }
 0xed0   :  { %v1401_v2 = vpop.eup %1400 }
 0xed1   :  { %770 = vrot.lane.b32.xlu0 %v1401_v2, %s1470_s21 }
 0xed2   :  { %v1403_v6 = vpop.eup %1402 }
 0xed3   :  { %v761_v4 = vadd.f32 1.0, %v1403_v6 }
 0xed5   :  { %1404 = vrcp.f32 %v761_v4 }
 0xedf   :  { %v1405_v7 = vpop.eup %1404 }
 0xee0   :  { %v768_v12 = vmul.f32 %v1405_v7, %v766_v10 }
 0xf43   :  { %v771_v8 = vpop.permute.xlu0 %770 }
 0xf44   :  { %v773_v11 = vmul.f32 %v1405_v7, %v771_v8 }
 0xf46   :  { %775 = vrot.lane.b32.xlu1 %v773_v11, %s1471_s4 }
 0xfb8   :  { %v776_v13 = vpop.permute.xlu1 %775 }
 0xfb9   :  { %v778_v14 = vadd.f32 %v776_v13, %v768_v12 }
 0xfbb   :  { %1406 = vtanh.f32 %v778_v14 }
 0xfc5   :  { %v1407_v15 = vpop.eup %1406 }
 0xfc6   :  { %781 = vrot.lane.b32.xlu0 %v1407_v15, %s1470_s21 }
0x1038   :  { %v782_v16 = vpop.permute.xlu0 %781 }
0x1039   :  { %v784_v17 = vmul.f32 %v1405_v7, %v782_v16 }
0x103b   :  { %v786_v18 = vrot.slane %v784_v17, 5 }
0x103d   :  { %787 = vrot.lane.b32.xlu1 %v786_v18, %s1471_s4 }
0x10af   :  { %v788_v19 = vpop.permute.xlu1 %787 }
0x10b0   :  { %1272 = vmatmul.mubr.msk.f32.vlgmr.msra.gmra.mrb[6].mxu1 %vm152_vm3, %v788_v19 }
0x10b1   :  { %1293 = vmatprep.mubr.msk.f32.mxu1 %vm1468_vm0, %v1469_v9  ;;  %v873_v9 = vrot.slane %v778_v14, 7 }
0x1183   :  { %v857_v20 = vpop.f32.mrb[6].mxu1 }
0x1184   :  { %v862_v21 = vrot.slane %v857_v20, 2  ;;  %v1273_v22 = vpop.f32.mrb[7].mxu1 }
0x1186   :  { %v864_v23 = vadd.f32 %v862_v21, %v1600_v24 }
0x1188   :  { %1408 = vtanh.f32 %v864_v23  ;;  %v1138_v26 = vmul.f32 -1.442695, %v864_v23 }
0x118a   :  { %1410 = vpow2.f32 %v1138_v26 }
0x1192   :  { %v1409_v25 = vpop.eup %1408 }
0x1193   :  { %877 = vrot.lane.b32.xlu0 %v1409_v25, %s1470_s21 }
0x1194   :  { %v1411_v27 = vpop.eup %1410 }
0x1195   :  { %v868_v28 = vadd.f32 1.0, %v1411_v27 }
0x1197   :  { %1412 = vrcp.f32 %v868_v28 }
0x11a1   :  { %v1413_v29 = vpop.eup %1412 }
0x11a2   :  { %v875_v32 = vmul.f32 %v1413_v29, %v873_v9 }
0x1205   :  { %v878_v30 = vpop.permute.xlu0 %877 }
0x1206   :  { %v880_v31 = vmul.f32 %v1413_v29, %v878_v30 }
0x1208   :  { %882 = vrot.lane.b32.xlu1 %v880_v31, %s1471_s4 }
0x127a   :  { %v883_v33 = vpop.permute.xlu1 %882 }
0x127b   :  { %v885_v34 = vadd.f32 %v883_v33, %v875_v32 }
0x127d   :  { %1414 = vtanh.f32 %v885_v34  ;;  %v980_v51 = vrot.slane %v885_v34, 7 }
0x1287   :  { %v1415_v35 = vpop.eup %1414 }
0x1288   :  { %888 = vrot.lane.b32.xlu0 %v1415_v35, %s1470_s21 }
0x12fa   :  { %v889_v36 = vpop.permute.xlu0 %888 }
0x12fb   :  { %v891_v37 = vmul.f32 %v1413_v29, %v889_v36 }
0x12fd   :  { %v893_v38 = vrot.slane %v891_v37, 6 }
0x12ff   :  { %894 = vrot.lane.b32.xlu1 %v893_v38, %s1471_s4 }
0x1371   :  { %v895_v39 = vpop.permute.xlu1 %894 }
0x1372   :  { %1283 = vmatmul.mubr.msk.f32.vlgmr.msra.gmra.mrb[8].mxu0 %vm152_vm3, %v895_v39 }
0x1445   :  { %v964_v40 = vpop.f32.mrb[8].mxu0 }
0x1446   :  { %v969_v41 = vrot.slane %v964_v40, 1  ;;  %v1284_v42 = vpop.f32.mrb[9].mxu0 }
0x1448   :  { %v971_v43 = vadd.f32 %v969_v41, %v1600_v24  ;;  %v999_v24 = vld [vmem:[%s1717_s5] sm:$0xff]  ;;  %s1472_s5 = smov [#allocation5]  }
0x1449   :  { %v1348_v57 = vpack.c.bf16 %v1000_v55, %v999_v24  ;;  %s1101_s6 = sshll.u32 %s1472_s5, 4  ;;  %s1102_s6 = int_to_ptr.vmem [resolvable:$true] %s1101_s6 }
0x144a   :  { %1416 = vtanh.f32 %v971_v43  ;;  %v1140_v45 = vmul.f32 -1.442695, %v971_v43  ;;  %s1440_s0 = scalar_lea.vmem %s1102_s6, 16  ;;  %s1444_s10 = scalar_lea.vmem %s1102_s6, 32 }
0x144b   :  { %1349 = vmatpush3.bf16.msra.mxu1 %v1348_v57  ;;  %p1441_p5 = scmp.ne.s32.totalorder %s1102_s6, %s1440_s0  ;;  %p1445_p6 = scmp.lt.s32.totalorder %s1102_s6, %s1102_s6 }
0x144c   :  { %1418 = vpow2.f32 %v1140_v45  ;;  %1350 = vmatprep.subr.bf16.mxu1 %v1467_v3  ;;  %p1446_p7 = scmp.lt.s32.totalorder %s1444_s10, %s1440_s0 }
0x144e   :  { %p1447_p8 = por %p1446_p7, %p1445_p6 }
0x144f   :  { %1352 = vmatpush3.bf16.msra.mxu1 %v1351_v59 }
0x1450   :  { %p1448_p9 = pnand %p1447_p8, %p1441_p5 }
0x1454   :  { %v1417_v44 = vpop.eup %1416 }
0x1455   :  { %984 = vrot.lane.b32.xlu0 %v1417_v44, %s1470_s21 }
0x1456   :  { %v1419_v46 = vpop.eup %1418 }
0x1457   :  { %v975_v47 = vadd.f32 1.0, %v1419_v46 }
0x1459   :  { %1420 = vrcp.f32 %v975_v47 }
0x1463   :  { %v1421_v48 = vpop.eup %1420 }
0x1464   :  { %v982_v52 = vmul.f32 %v1421_v48, %v980_v51 }
0x14c7   :  { %v985_v49 = vpop.permute.xlu0 %984 }
0x14c8   :  { %v987_v50 = vmul.f32 %v1421_v48, %v985_v49 }
0x14ca   :  { %989 = vrot.lane.b32.xlu1 %v987_v50, %s1471_s4 }
0x153c   :  { %v990_v53 = vpop.permute.xlu1 %989 }
0x153d   :  { %v992_v54 = vadd.f32 %v990_v53, %v982_v52 }
0x153f   :  { %1422 = vtanh.f32 %v992_v54 }
0x1549   :  { %v1423_v60 = vpop.eup %1422 }
0x154a   :  { %995 = vrot.lane.b32.xlu0 %v1423_v60, %s1470_s21 }
0x15bc   :  { %v996_v61 = vpop.permute.xlu0 %995 }
0x15bd   :  { %v998_v62 = vmul.f32 %v1421_v48, %v996_v61 }
0x15bf   :  { %v1005_v63 = vrot.slane %v998_v62, 7 }
0x15c1   :  { %1006 = vrot.lane.b32.xlu1 %v1005_v63, %s1471_s4 }
0x1633   :  { %v1007_v0 = vpop.permute.xlu1 %1006 }
0x1634   :  { %1294 = vmatmul.mubr.msk.f32.vlgmr.msra.gmra.mrb[8].mxu1 %vm152_vm3, %v1007_v0 }
0x1707   :  { %v1076_v2 = vpop.f32.mrb[8].mxu1 }
0x1708   :  { %v1077_v5 = vadd.f32 %v1076_v2, %v1003_v1  ;;  %v1295_v6 = vpop.f32.mrb[9].mxu1 }
0x170a   :  { %v1080_v3 = vmax.f32 %v1077_v5, 0.0 }
0x170c   :  { %v1082_v4 = vsel %vm1081_vm4, %v1080_v3, -inf }
0x170d   :  { %1083 = vmax.xlane.f32.xlu0 %v1082_v4 }
0x179a   :  { %v1084_v7 = vpop.xlane.xlu0 %1083 }
0x179b   :  { %v1085_v8 = vsub.f32 %v1080_v3, %v1084_v7 }
0x179d   :  { %v1086_v11 = vmul.f32 1.442695, %v1085_v8 }
0x179f   :  { %1424 = vpow2.f32 %v1086_v11 }
0x17a9   :  { %v1425_v10 = vpop.eup %1424 }
0x17aa   :  { %v1088_v12 = vsel %vm1081_vm4, %v1425_v10, 0.0 }
0x17ab   :  { %1089 = vadd.xlane.f32.xlu1 %v1088_v12 }
0x1838   :  { %v1090_v13 = vpop.xlane.xlu1 %1089 }
0x1839   :  { %1426 = vlog2.f32 %v1090_v13 }
0x1843   :  { %v1427_v14 = vpop.eup %1426 }
0x1844   :  { %v1092_v15 = vmul.f32 0.6931472, %v1427_v14 }
0x1846   :  { %v1093_v16 = vsub.f32 %v1085_v8, %v1092_v15 }
0x1848   :  { %1094 = vst.msk [vmem:[#allocation5] sm:$0x1] %vm1081_vm4, %v1093_v16 }
0x1849   :  { %1451 = shalt.err (!%p1448_p9)
}
0x184a   :  { %s1452_s13 = scalar_lea.hbm %s1719_s7, 16 }
0x184b   :  { %p1453_p10 = scmp.ne.s32.totalorder %s1719_s7, %s1452_s13  ;;  %p1456_p11 = scmp.lt.u32.totalorder %s1452_s13, %s1719_s7 }
0x184d   :  { %p1458_p12 = pnand %p1456_p11, %p1453_p10 }
0x184f   :  { %1461 = shalt.err (!%p1458_p12)
}
0x1850   :  { %1104 = dma.vmem_to_hbm [thread:$0]  %s1102_s6, 16, %s1719_s7, [#allocation6]  }
0x1851   :  { %1464 = dma.done.wait [#allocation6], 16  }
0x1852   :  { %1465 = vsyncadd [#allocation6], 4294967280 }
0x1853   :  { %1108 = vsyncpa [#allocation6], 1 }

</bundles_post_ra>
